<compile_context>
chip_gen: v5e
topology: v5e:2x2
jax: 0.10.0
libtpu: 0.0.40
codegen_flags: <defaults>
</compile_context>

<pallas_src>
import functools

import jax
import jax.numpy as jnp
from jax.experimental import pallas as pl
from jax.experimental.pallas import tpu as pltpu

IN_DIM = 23
HID = 128
OUT_DIM = 5


def qnet_kernel(x_ref, w1_ref, b1_ref, w2_ref, b2_ref, w3_ref, b3_ref, o_ref):
    # One (TILE_B, IN_DIM) batch tile; weights/biases are VMEM-resident full blocks.
    x = x_ref[...]
    # MXU matmuls take bf16 operands, accumulate in f32; bias + ReLU stay f32 (VPU).
    h1 = jnp.dot(x.astype(w1_ref.dtype), w1_ref[...],
                 preferred_element_type=jnp.float32) + b1_ref[...]
    h1 = jnp.maximum(h1, 0.0)
    h2 = jnp.dot(h1.astype(w2_ref.dtype), w2_ref[...],
                 preferred_element_type=jnp.float32) + b2_ref[...]
    h2 = jnp.maximum(h2, 0.0)
    out = jnp.dot(h2.astype(w3_ref.dtype), w3_ref[...],
                  preferred_element_type=jnp.float32) + b3_ref[...]
    # (tile_b, 5) store: masked VMEM-side vst, free here (compute has huge slack),
    # and the HBM writeback is the minimal ~20 B/row instead of 512 B/row.
    o_ref[...] = out.astype(o_ref.dtype)


def _round_up(a, m):
    return ((a + m - 1) // m) * m


def _batch_dim_semantics(num_batch_tiles):
    """CORE_PARALLEL on v7x (2 TensorCores/chip); plain "parallel" elsewhere."""
    try:
        kind = jax.devices()[0].device_kind.lower()
    except Exception:
        kind = ""
    if num_batch_tiles > 1 and ("v7" in kind or "7x" in kind):
        return (pltpu.CORE_PARALLEL,)
    return ("parallel",)


def prepare_qnet_params(params):
    """One-time param prep (call OUTSIDE the per-step RL loop, not per forward).

    Weights -> bf16 (native MXU operand format, halves weight HBM traffic);
    biases stay f32 (f32 epilogue; v5e has no bf16 VPU).
    """
    w1, b1, w2, b2, w3, b3 = params
    bf = jnp.bfloat16
    return (w1.astype(bf), b1, w2.astype(bf), b2, w3.astype(bf), b3)


@functools.partial(jax.jit, static_argnames=("tile_b",))
def qnet_forward(x, prepared_params, *, tile_b=4096):
    """Pallas forward for Qnet. x: (B, 23) f32. Returns (B, 5) f32.

    `prepared_params` must come from prepare_qnet_params (bf16 weights, f32 biases).
    """
    w1, b1, w2, b2, w3, b3 = prepared_params

    B = x.shape[0]
    # Clamp the tile for tiny batches; multiples of 8 sublanes (f32 x).
    tile_b = max(8, min(tile_b, _round_up(B, 8)))
    b_pad = _round_up(B, tile_b)
    if b_pad != B:
        x = jnp.pad(x, ((0, b_pad - B), (0, 0)))  # zero rows, sliced off below

    num_tiles = b_pad // tile_b
    grid = (num_tiles,)

    # Resident operands: constant index_map => DMA'd once, stay in VMEM across the
    # whole grid; single-buffered (never refetched, so no point double-buffering).
    resident = lambda shape: pl.BlockSpec(shape, lambda i: (0, 0),
                                          pipeline_mode=pl.Buffered(1))

    out = pl.pallas_call(
        qnet_kernel,
        out_shape=jax.ShapeDtypeStruct((b_pad, OUT_DIM), jnp.float32),
        grid=grid,
        in_specs=[
            pl.BlockSpec((tile_b, IN_DIM), lambda i: (i, 0)),   # x blocked along batch
            resident(w1.shape), resident(b1.shape),
            resident(w2.shape), resident(b2.shape),
            resident(w3.shape), resident(b3.shape),
        ],
        # Narrow output block: last dim (5) == full array dim, legal and contiguous.
        out_specs=pl.BlockSpec((tile_b, OUT_DIM), lambda i: (i, 0)),
        compiler_params=pltpu.CompilerParams(
            dimension_semantics=_batch_dim_semantics(num_tiles),
            # tile_b=4096 => ~9 MiB VMEM (2x x-block + 2x out-block + weights);
            # sized against v7x's 64 MiB physical / 32 MiB scoped default.
            vmem_limit_bytes=32 * 1024 * 1024,
        ),
    )(x, w1, b1, w2, b2, w3, b3)

    return out if b_pad == B else out[:B]


def init_params(key):
    """Deterministic init mimicking PyTorch nn.Linear default (U(-1/sqrt(fan_in), +))."""
    dims = [(IN_DIM, HID), (HID, HID), (HID, OUT_DIM)]
    params = []
    for fan_in, fan_out in dims:
        kw, kb, key = jax.random.split(key, 3)
        bound = 1.0 / jnp.sqrt(jnp.float32(fan_in))
        w = jax.random.uniform(kw, (fan_in, fan_out), jnp.float32, -bound, bound)
        b = jax.random.uniform(kb, (1, fan_out), jnp.float32, -bound, bound)
        params += [w, b]
    return tuple(params)


def reference_forward_f32(x, params):
    """Pure f32 reference (exact PyTorch Qnet.forward semantics)."""
    w1, b1, w2, b2, w3, b3 = params
    h1 = jnp.maximum(x @ w1 + b1, 0.0)
    h2 = jnp.maximum(h1 @ w2 + b2, 0.0)
    return h2 @ w3 + b3


def reference_forward_bf16(x, params):
    """Reference that matches the kernel's bf16-operand / f32-accumulate dots."""
    w1, b1, w2, b2, w3, b3 = params
    bf = jnp.bfloat16
    h1 = jnp.maximum(jnp.dot(x.astype(bf), w1.astype(bf),
                             preferred_element_type=jnp.float32) + b1, 0.0)
    h2 = jnp.maximum(jnp.dot(h1.astype(bf), w2.astype(bf),
                             preferred_element_type=jnp.float32) + b2, 0.0)
    return jnp.dot(h2.astype(bf), w3.astype(bf),
                   preferred_element_type=jnp.float32) + b3


if __name__ == "__main__":
    key = jax.random.PRNGKey(0)
    kx, kp = jax.random.split(key)

    B = 37  # non-multiple of 8 / of the tile: exercises batch padding + multi-tile grid
    x = jax.random.normal(kx, (B, IN_DIM), dtype=jnp.float32)
    params = init_params(kp)                  # f32, PyTorch-equivalent layout
    kparams = prepare_qnet_params(params)     # one-time bf16 weight prep (outside hot path)

    # Multi-tile grid (3 tiles of 16 rows): pipeline + padding coverage.
    out_tiled = jax.block_until_ready(qnet_forward(x, kparams, tile_b=16))
    # Default (clamped) single-tile path, i.e. what an RL driver would hit.
    out = jax.block_until_ready(qnet_forward(x, kparams))
    assert out.shape == (B, OUT_DIM)
    assert jnp.allclose(out, out_tiled, atol=1e-5, rtol=1e-5)

    # Bit-level semantics check vs a reference using the same bf16-operand dots.
    ref_bf16 = reference_forward_bf16(x, params)
    assert jnp.allclose(out, ref_bf16, atol=1e-3, rtol=1e-3)

    # Looser check vs the exact f32 PyTorch-semantics reference (bf16 weight quantization).
    ref_f32 = reference_forward_f32(x, params)
    assert jnp.allclose(out, ref_f32, atol=5e-2)

    print("KERNEL_OK")
</pallas_src>

<mosaic_0001>
module attributes {stable_mosaic.version = 11 : i64} {
  func.func @qnet_kernel(%arg0: i32, %arg1: memref<16x23xf32, #tpu.memory_space<vmem>>, %arg2: memref<23x128xbf16, #tpu.memory_space<vmem>>, %arg3: memref<1x128xf32, #tpu.memory_space<vmem>>, %arg4: memref<128x128xbf16, #tpu.memory_space<vmem>>, %arg5: memref<1x128xf32, #tpu.memory_space<vmem>>, %arg6: memref<128x5xbf16, #tpu.memory_space<vmem>>, %arg7: memref<1x5xf32, #tpu.memory_space<vmem>>, %arg8: memref<16x5xf32, #tpu.memory_space<vmem>>) attributes {dimension_semantics = [#tpu.dimension_semantics<parallel>], iteration_bounds = array<i64: 3>, scalar_prefetch = 0 : i64, scratch_operands = 0 : i64, tpu.core_type = #tpu.core_type<tc>, window_params = [{transform_indices = @transform_0, window_bounds = array<i64: 16, 23>}, {pipeline_mode = #tpu.pipeline_mode<synchronous>, transform_indices = @transform_1, window_bounds = array<i64: 23, 128>}, {pipeline_mode = #tpu.pipeline_mode<synchronous>, transform_indices = @transform_2, window_bounds = array<i64: 1, 128>}, {pipeline_mode = #tpu.pipeline_mode<synchronous>, transform_indices = @transform_3, window_bounds = array<i64: 128, 128>}, {pipeline_mode = #tpu.pipeline_mode<synchronous>, transform_indices = @transform_4, window_bounds = array<i64: 1, 128>}, {pipeline_mode = #tpu.pipeline_mode<synchronous>, transform_indices = @transform_5, window_bounds = array<i64: 128, 5>}, {pipeline_mode = #tpu.pipeline_mode<synchronous>, transform_indices = @transform_6, window_bounds = array<i64: 1, 5>}, {transform_indices = @transform_7, window_bounds = array<i64: 16, 5>}]} {
    %c0 = arith.constant 0 : index
    %c0_0 = arith.constant 0 : index
    %0 = vector.load %arg1[%c0, %c0_0] : memref<16x23xf32, #tpu.memory_space<vmem>>, vector<16x23xf32>
    %1 = arith.truncf %0 : vector<16x23xf32> to vector<16x23xbf16>
    %c0_1 = arith.constant 0 : index
    %c0_2 = arith.constant 0 : index
    %2 = vector.load %arg2[%c0_1, %c0_2] : memref<23x128xbf16, #tpu.memory_space<vmem>>, vector<23x128xbf16>
    %cst = arith.constant dense<0.000000e+00> : vector<16x128xf32>
    %3 = tpu.matmul %1, %2, %cst {dimension_numbers = #tpu.dot_dimension_numbers<[1], [0], [0], [1], [0, 0, 1, 1], [], []>} : vector<16x23xbf16>, vector<23x128xbf16>, vector<16x128xf32> -> vector<16x128xf32>
    %c0_3 = arith.constant 0 : index
    %c0_4 = arith.constant 0 : index
    %4 = vector.load %arg3[%c0_3, %c0_4] : memref<1x128xf32, #tpu.memory_space<vmem>>, vector<1x128xf32>
    %5 = vector.broadcast %4 : vector<1x128xf32> to vector<16x128xf32>
    %6 = arith.addf %3, %5 : vector<16x128xf32>
    %cst_5 = arith.constant 0.000000e+00 : f32
    %7 = vector.broadcast %cst_5 : f32 to vector<16x128xf32>
    %8 = arith.maximumf %6, %7 : vector<16x128xf32>
    %9 = arith.truncf %8 : vector<16x128xf32> to vector<16x128xbf16>
    %c0_6 = arith.constant 0 : index
    %c0_7 = arith.constant 0 : index
    %10 = vector.load %arg4[%c0_6, %c0_7] : memref<128x128xbf16, #tpu.memory_space<vmem>>, vector<128x128xbf16>
    %cst_8 = arith.constant dense<0.000000e+00> : vector<16x128xf32>
    %11 = tpu.matmul %9, %10, %cst_8 {dimension_numbers = #tpu.dot_dimension_numbers<[1], [0], [0], [1], [0, 0, 1, 1], [], []>} : vector<16x128xbf16>, vector<128x128xbf16>, vector<16x128xf32> -> vector<16x128xf32>
    %c0_9 = arith.constant 0 : index
    %c0_10 = arith.constant 0 : index
    %12 = vector.load %arg5[%c0_9, %c0_10] : memref<1x128xf32, #tpu.memory_space<vmem>>, vector<1x128xf32>
    %13 = vector.broadcast %12 : vector<1x128xf32> to vector<16x128xf32>
    %14 = arith.addf %11, %13 : vector<16x128xf32>
    %cst_11 = arith.constant 0.000000e+00 : f32
    %15 = vector.broadcast %cst_11 : f32 to vector<16x128xf32>
    %16 = arith.maximumf %14, %15 : vector<16x128xf32>
    %17 = arith.truncf %16 : vector<16x128xf32> to vector<16x128xbf16>
    %c0_12 = arith.constant 0 : index
    %c0_13 = arith.constant 0 : index
    %18 = vector.load %arg6[%c0_12, %c0_13] : memref<128x5xbf16, #tpu.memory_space<vmem>>, vector<128x5xbf16>
    %cst_14 = arith.constant dense<0.000000e+00> : vector<16x5xf32>
    %19 = tpu.matmul %17, %18, %cst_14 {dimension_numbers = #tpu.dot_dimension_numbers<[1], [0], [0], [1], [0, 0, 1, 1], [], []>} : vector<16x128xbf16>, vector<128x5xbf16>, vector<16x5xf32> -> vector<16x5xf32>
    %c0_15 = arith.constant 0 : index
    %c0_16 = arith.constant 0 : index
    %20 = vector.load %arg7[%c0_15, %c0_16] : memref<1x5xf32, #tpu.memory_space<vmem>>, vector<1x5xf32>
    %21 = vector.broadcast %20 : vector<1x5xf32> to vector<16x5xf32>
    %22 = arith.addf %19, %21 : vector<16x5xf32>
    %c0_17 = arith.constant 0 : index
    %c0_18 = arith.constant 0 : index
    %23 = vector.load %arg8[%c0_17, %c0_18] : memref<16x5xf32, #tpu.memory_space<vmem>>, vector<16x5xf32>
    tpu.vector_store %arg8[%c0_17, %c0_18], %22 {strides = array<i32>} : memref<16x5xf32, #tpu.memory_space<vmem>>, vector<16x5xf32>,
    return
  }
  func.func @transform_0(%arg0: i32) -> (i32, i32) {
    %c0_i32 = arith.constant 0 : i32
    %c0_i32_0 = arith.constant 0 : i32
    return %arg0, %c0_i32 : i32, i32
  }
  func.func @transform_1(%arg0: i32) -> (i32, i32) {
    %c0_i32 = arith.constant 0 : i32
    %c0_i32_0 = arith.constant 0 : i32
    %c0_i32_1 = arith.constant 0 : i32
    return %c0_i32, %c0_i32_0 : i32, i32
  }
  func.func @transform_2(%arg0: i32) -> (i32, i32) {
    %c0_i32 = arith.constant 0 : i32
    %c0_i32_0 = arith.constant 0 : i32
    %c0_i32_1 = arith.constant 0 : i32
    return %c0_i32, %c0_i32_0 : i32, i32
  }
  func.func @transform_3(%arg0: i32) -> (i32, i32) {
    %c0_i32 = arith.constant 0 : i32
    %c0_i32_0 = arith.constant 0 : i32
    %c0_i32_1 = arith.constant 0 : i32
    return %c0_i32, %c0_i32_0 : i32, i32
  }
  func.func @transform_4(%arg0: i32) -> (i32, i32) {
    %c0_i32 = arith.constant 0 : i32
    %c0_i32_0 = arith.constant 0 : i32
    %c0_i32_1 = arith.constant 0 : i32
    return %c0_i32, %c0_i32_0 : i32, i32
  }
  func.func @transform_5(%arg0: i32) -> (i32, i32) {
    %c0_i32 = arith.constant 0 : i32
    %c0_i32_0 = arith.constant 0 : i32
    %c0_i32_1 = arith.constant 0 : i32
    return %c0_i32, %c0_i32_0 : i32, i32
  }
  func.func @transform_6(%arg0: i32) -> (i32, i32) {
    %c0_i32 = arith.constant 0 : i32
    %c0_i32_0 = arith.constant 0 : i32
    %c0_i32_1 = arith.constant 0 : i32
    return %c0_i32, %c0_i32_0 : i32, i32
  }
  func.func @transform_7(%arg0: i32) -> (i32, i32) {
    %c0_i32 = arith.constant 0 : i32
    %c0_i32_0 = arith.constant 0 : i32
    return %arg0, %c0_i32 : i32, i32
  }
}

</mosaic_0001>

<bundles_post_ra>
// kernel: qnet_forward.1
= control target key start
LH: loop header
LB: loop body
LE: loop exit
PB: predicated region body
PF: predicated region fallthrough
CT: control target
= control target key end

     0   :  { %s714_s24 = smov 0   ;;  %s801_s0 = inlined_call_operand.vmem [shape: f32[48,23], index: 0, kind: input, shape index: {}]   ;;  %s802_s1 = inlined_call_operand.vmem [shape: bf16[23,128], index: 1, kind: input, shape index: {}]   ;;  %s803_s2 = inlined_call_operand.vmem [shape: f32[1,128], index: 2, kind: input, shape index: {}]   ;;  %s804_s3 = inlined_call_operand.vmem [shape: bf16[128,128], index: 3, kind: input, shape index: {}]   ;;  %s805_s4 = inlined_call_operand.vmem [shape: f32[1,128], index: 4, kind: input, shape index: {}]   ;;  %s806_s5 = inlined_call_operand.vmem [shape: bf16[128,5], index: 5, kind: input, shape index: {}]   ;;  %s807_s6 = inlined_call_operand.vmem [shape: f32[1,5], index: 6, kind: input, shape index: {}]   ;;  %s808_s7 = inlined_call_operand.vmem [shape: f32[48,5], index: 7, kind: output, shape index: {}]  }
   0x1 LB: > { %s556_s25 = sadd.s32 4294967295, %s671_s24   ;;  %p560_p0 = scmp.ge.s32.totalorder %s671_s24, 1  ;;  %s671_s24 = sphi %s714_s24, %s17_s24  }
   0x2   : > { %p238_p1 = scmp.lt.s32.totalorder %s671_s24, 4 }
   0x4   : > { %p239_p2 = pnand %p560_p0, %p238_p1 }
   0x5   : > { %s561_s28 = sshll.u32 (!%p239_p2), %s556_s25, 1 }
   0x6   : > { %242 = sbr.rel (%p239_p2) target bundleno = 448 (0x1c0), region = 48  ;;  %p271_p3 = scmp.lt.s32.totalorder (!%p239_p2), %s561_s28, 5 }
   0xb   : > { %v288_v0 = vld [vmem:[%s802_s1 + $0x8] sm:$0xf]  ;;  %vm306_vm0 = vcmask 1042432   ;;  %vm307_vm1 = vcmask 1043456   ;;  %v673_v2 = vmov 65535   ;;  %v644_v4 = vld [vmem:[%s804_s3 + $0x38] sm:$0xff] }
   0xc   : > { %v298_v1 = vunpack.c.l.b16 %v288_v0  ;;  %v308_v3 = vsel %vm306_vm0, 4294967295, %v673_v2  ;;  %398 = vmatpush.bf16.msra.mxu1 %v644_v4  ;;  %v643_v7 = vld [vmem:[%s804_s3 + $0x30] sm:$0xff]  ;;  %s810_s28 = smov (!%p271_p3, %s561_s28), 5  ;;  %v636_v9 = vld [vmem:[%s802_s1] sm:$0xff]  ;;  %v642_v10 = vld [vmem:[%s804_s3 + $0x28] sm:$0xff]  ;;  %vm302_vm2 = vcmask 187392  }
   0xd   : > { %v309_v5 = vsel %vm307_vm1, %v308_v3, 0  ;;  %s562_s10 = sshll.u32 %s810_s28, 3  ;;  %v641_v14 = vld [vmem:[%s804_s3 + $0x20] sm:$0xff]  ;;  %v640_v15 = vld [vmem:[%s804_s3 + $0x18] sm:$0xff]  ;;  %v639_v16 = vld [vmem:[%s804_s3 + $0x10] sm:$0xff]  ;;  %vm497_vm3 = vcmask 39936  }
   0xe   : > { %v300_v6 = vpack.c.b16 %v298_v1, %v298_v1  ;;  %s274_s15 = scalar_lea.vmem %s801_s0, %s562_s10  ;;  %v638_v17 = vld [vmem:[%s804_s3 + $0x8] sm:$0xff]  ;;  %v637_v18 = vld [vmem:[%s804_s3] sm:$0xff]  ;;  %v652_v19 = vld [vmem:[%s806_s5 + $0x38] sm:$0xff]  ;;  %s280_s12 = scalar_lea.vmem %s808_s7, %s562_s10 }
   0xf   : > { %v283_v11 = vld [vmem:[%s274_s15] sm:$0xff]  ;;  %v284_v12 = vld [vmem:[%s274_s15 + $0x8] sm:$0xff]  ;;  %483 = vmatpush.bf16.msra.mxu2 %v652_v19  ;;  %v651_v20 = vld [vmem:[%s806_s5 + $0x30] sm:$0xff] }
  0x10   : > { %v311_v8 = vand.u32 %v309_v5, %v300_v6  ;;  %399 = vmatpush.bf16.msra.mxu1 %v643_v7  ;;  %v285_v13 = vpack.c.bf16 %v284_v12, %v283_v11  ;;  %v650_v21 = vld [vmem:[%s806_s5 + $0x28] sm:$0xff]  ;;  %v649_v22 = vld [vmem:[%s806_s5 + $0x20] sm:$0xff]  ;;  %v648_v31 = vld [vmem:[%s806_s5 + $0x18] sm:$0xff] }
  0x11   : > { %v662_v24 = vld [vmem:[%s803_s2] ss:$0 sm:$0xff]  ;;  %v647_v32 = vld [vmem:[%s806_s5 + $0x10] sm:$0xff]  ;;  %v646_v33 = vld [vmem:[%s806_s5 + $0x8] sm:$0xff] }
  0x12   : > { %319 = vmatpush.bf16.msra.mxu0 %v311_v8  ;;  %v645_v34 = vld [vmem:[%s806_s5] sm:$0xff] }
  0x13   : > { %484 = vmatpush.bf16.msra.mxu2 %v651_v20  ;;  %v663_v36 = vld [vmem:[%s805_s4] ss:$0 sm:$0xff] }
  0x14   : > { %400 = vmatpush.bf16.msra.mxu1 %v642_v10  ;;  %v664_v43 = vld [vmem:[%s807_s6] ss:$0 sm:$0xff] }
  0x16   : > { %320 = vmatpush.bf16.msra.mxu0 %v636_v9 }
  0x17   : > { %485 = vmatpush.bf16.msra.mxu2 %v650_v21 }
  0x18   : > { %401 = vmatpush.bf16.msra.mxu1 %v641_v14 }
  0x19   : > { %569 = vmatmul.msk.bf16.vlgmr.msra.gmra.mxu0 %vm302_vm2, %v285_v13 }
  0x1b   : > { %486 = vmatpush.bf16.msra.mxu2 %v649_v22 }
  0x1c   : > { %402 = vmatpush.bf16.msra.mxu1 %v640_v15 }
  0x1f   : > { %487 = vmatpush.bf16.msra.mxu2 %v648_v31 }
  0x20   : > { %403 = vmatpush.bf16.msra.mxu1 %v639_v16 }
  0x23   : > { %488 = vmatpush.bf16.msra.mxu2 %v647_v32 }
  0x24   : > { %404 = vmatpush.bf16.msra.mxu1 %v638_v17 }
  0x27   : > { %489 = vmatpush.bf16.msra.mxu2 %v646_v33 }
  0x28   : > { %405 = vmatpush.bf16.msra.mxu1 %v637_v18 }
  0x2b   : > { %490 = vmatpush.bf16.msra.mxu2 %v645_v34 }
  0x96   : > { %v322_v23 = vpop.f32.mrf.mxu0 }
  0x97   : > { %v323_v25 = vadd.f32 %v662_v24, %v322_v23 }
  0x99   : > { %v327_v28 = vmax.f32 %v323_v25, 0.0 }
  0x9e   : > { %v324_v26 = vpop.f32.mrf.mxu0 }
  0x9f   : > { %v325_v27 = vadd.f32 %v662_v24, %v324_v26 }
  0xa1   : > { %v328_v29 = vmax.f32 %v325_v27, 0.0 }
  0xa3   : > { %v329_v30 = vpack.c.bf16 %v328_v29, %v327_v28 }
  0xa5   : > { %406 = vmatmul.bf16.vlgmr.msra.gmra.mxu1 %v329_v30 }
 0x122   : > { %v407_v35 = vpop.f32.mrf.mxu1 }
 0x123   : > { %v408_v37 = vadd.f32 %v663_v36, %v407_v35 }
 0x125   : > { %v412_v40 = vmax.f32 %v408_v37, 0.0 }
 0x12a   : > { %v409_v38 = vpop.f32.mrf.mxu1 }
 0x12b   : > { %v410_v39 = vadd.f32 %v663_v36, %v409_v38 }
 0x12d   : > { %v413_v41 = vmax.f32 %v410_v39, 0.0 }
 0x12f   : > { %v414_v42 = vpack.c.bf16 %v413_v41, %v412_v40 }
 0x131   : > { %491 = vmatmul.bf16.vlgmr.msra.gmra.mxu2 %v414_v42 }
 0x1b4   : > { %v492_v44 = vpop.f32.mrf.mxu2 }
 0x1b5   : > { %v493_v45 = vadd.f32 %v664_v43, %v492_v44 }
 0x1b7   : > { %498 = vst.msk [vmem:[%s280_s12] sm:$0xff] %vm497_vm3, %v493_v45 }
 0x1bc   : > { %v494_v46 = vpop.f32.mrf.mxu2 }
 0x1bd   : > { %v495_v47 = vadd.f32 %v664_v43, %v494_v46 }
 0x1bf   : > { %499 = vst.msk [vmem:[%s280_s12 + $0x8] sm:$0xff] %vm497_vm3, %v495_v47 }
 0x1c0 PF: > { %s17_s24 = sadd.s32 1, %s671_s24  }
 0x1c1   : > { %p14_p4 = scmp.ge.s32.totalorder %s17_s24, 5  }
 0x1c3   :  { %16 = sbr.rel (!%p14_p4) target bundleno = 1 (0x1), region = 78 }

</bundles_post_ra>
